<compile_context>
chip_gen: v5e
topology: v5e:2x2
jax: 0.10.0
libtpu: 0.0.40
codegen_flags: <defaults>
</compile_context>

<pallas_src>
import functools

import jax
import jax.numpy as jnp
from jax import lax
from jax.experimental import pallas as pl
from jax.experimental.pallas import tpu as pltpu


# ------------------------------- small helpers -------------------------------

def _round_up(x, m):
    return ((x + m - 1) // m) * m


def _pick_tg(S, K):
    """Groups-per-tile for extraction: a divisor of S that is a multiple of 8
    (or S itself) so in-kernel reshapes stay tile-aligned, targeting a matmul
    M-dim (K*tg) of a few thousand rows while staying far inside VMEM."""
    cands = [t for t in range(1, S + 1) if S % t == 0 and (t % 8 == 0 or t == S)]
    good = [t for t in cands if K * t <= 4096]
    return max(good) if good else min(cands)


def _pick_tn(N):
    """N-tile for the distance kernel (multiple of 128, or the full N)."""
    for t in (2048, 1024, 512):
        if N % t == 0:
            return t
    return N


# ----------------------------- Pallas kernel bodies --------------------------

def _fps_kernel(xyz_ref, idx_ref, sel_ref):
    """Furthest point sampling for one batch row, entirely on-chip.

    Points are channels-first (3, N) so N sits on the lane dim.  Both the
    selected index vector (1, S) and the selected coordinates (3, S) are
    accumulated in registers with masked writes (no dynamic stores, no scalar
    extraction, no follow-up XLA gather) and stored once at the end."""
    pts = xyz_ref[0]                                           # (3, N) f32
    N = pts.shape[1]
    S = idx_ref.shape[2]
    lane = lax.broadcasted_iota(jnp.int32, (1, N), 1)          # point ids
    pos = lax.broadcasted_iota(jnp.int32, (1, S), 1)           # output slots

    def coords_of(last):                                       # (1,1) idx -> (3,1) xyz
        sel = lane == last
        return jnp.sum(jnp.where(sel, pts, 0.0), axis=1, keepdims=True)

    def body(i, carry):
        dist, last, idx_acc, xyz_acc = carry
        p_last = coords_of(last)                                                 # (3, 1)
        xyz_acc = jnp.where(pos == (i - 1), p_last, xyz_acc)                     # (3, S)
        d = jnp.sum((pts - p_last) ** 2, axis=0, keepdims=True)                  # (1, N)
        dist = jnp.minimum(dist, d)
        m = jnp.max(dist, axis=1, keepdims=True)                                 # (1, 1)
        nxt = jnp.min(jnp.where(dist == m, lane, N), axis=1, keepdims=True)      # argmax
        nxt = nxt.astype(jnp.int32)
        idx_acc = jnp.where(pos == i, nxt, idx_acc)                              # (1, S)
        return dist, nxt, idx_acc, xyz_acc

    dist0 = jnp.full((1, N), 1e10, jnp.float32)
    last0 = jnp.zeros((1, 1), jnp.int32)                       # slot 0 == index 0
    idx0 = jnp.zeros((1, S), jnp.int32)
    xyz0 = jnp.zeros((3, S), jnp.float32)
    _, last, idx_acc, xyz_acc = lax.fori_loop(1, S, body, (dist0, last0, idx0, xyz0))
    xyz_acc = jnp.where(pos == (S - 1), coords_of(last), xyz_acc)   # coords of last pick
    idx_ref[0] = idx_acc
    sel_ref[0] = xyz_acc


def _sqdist_kernel(q_ref, p_ref, o_ref):
    """|q_s - p_n|^2 for one batch row / one N-tile as a SINGLE MXU matmul.

    Channels-first operands: q is (3, S), p is (3, TN).  Row augmentation
    [-2x, -2y, -2z, |q|^2, 1] . [x, y, z, 1, |p|^2] folds both norm terms into
    the same contraction, so there is exactly one matmul, no broadcast adds,
    and the (S, TN) output stays lane-dense."""
    q = q_ref[0]                                               # (3, S)
    p = p_ref[0]                                               # (3, TN)
    S = q.shape[1]
    TN = p.shape[1]
    qn = jnp.sum(q * q, axis=0, keepdims=True)                 # (1, S)
    pn = jnp.sum(p * p, axis=0, keepdims=True)                 # (1, TN)
    q_aug = jnp.concatenate([-2.0 * q, qn, jnp.ones((1, S), q.dtype)], axis=0)
    p_aug = jnp.concatenate([p, jnp.ones((1, TN), p.dtype), pn], axis=0)
    o_ref[0] = lax.dot_general(q_aug, p_aug, (((0,), (0,)), ((), ())),
                               preferred_element_type=jnp.float32)


def _anchor_norm_kernel(g_ref, m_ref, a_ref, b_ref, o_ref, *, c_real):
    """(grouped - anchor), normalized by the per-batch Bessel-corrected std of
    the differences (torch.std over all S*K*C elements).  alpha/(std+eps) is
    folded into a per-channel scale so the epilogue is one FMA per element.
    Padded channel lanes are exact zeros in both inputs, so the moments use the
    cheap single-pass form with no lane masks / iota; padded output lanes stay
    exact zeros (alpha/beta are zero there)."""
    g = g_ref[0]                                               # (K, S, C1p) f32
    m = m_ref[...]                                             # (1, S, C1p)
    d = g - m                                                  # zero on padded lanes
    K, S, _ = g.shape
    n = K * S * c_real
    s1 = jnp.sum(d, axis=(0, 1, 2), keepdims=True)             # padded lanes add 0
    s2 = jnp.sum(d * d, axis=(0, 1, 2), keepdims=True)
    mu = s1 / n
    var = jnp.maximum((s2 - n * mu * mu) / (n - 1), 0.0)       # Bessel-corrected
    inv = 1.0 / (jnp.sqrt(var) + 1e-5)                         # (1, 1, 1)
    scale = a_ref[...] * inv                                   # (1, 1, C1p) via bcast
    o_ref[0] = (d * scale + b_ref[...]).astype(o_ref.dtype)


def _extraction_kernel(y_ref, a_ref, w1a_ref, w1b_ref, w2_ref, w3_ref,
                       sh1_ref, sh2_ref, b3_ref, o_ref):
    """PreExtraction for a tile of `tg` groups x K neighbours.

    transfer/net1 BatchNorms (eval mode, fresh running stats) are pre-folded into
    the weights; the first 1x1 conv is split so the anchor-feature half (and its
    bias) is computed once per group instead of once per (group, k); matmul
    operands are bf16 (f32 accumulation, f32 elementwise); adaptive_max_pool1d
    over k is a cross-vreg max over the leading axis."""
    _, K, TG, C1p = y_ref.shape
    Dp = o_ref.shape[2]
    y = y_ref[0].reshape(K * TG, C1p)                          # free: TG%8==0, C1p%128==0
    a = a_ref[0]                                               # (TG, Dinp) bf16
    # transfer: Conv1d + folded BN + ReLU, split into grouped / anchor halves
    hg = jnp.dot(y, w1a_ref[...], preferred_element_type=jnp.float32)           # (K*TG, Dp)
    ha = jnp.dot(a, w1b_ref[...], preferred_element_type=jnp.float32) + sh1_ref[...]  # (TG, Dp)
    h1 = jnp.maximum(hg.reshape(K, TG, Dp) + ha[None, :, :], 0.0)
    h1 = h1.reshape(K * TG, Dp)
    # ConvBNReLURes1D.net1: Conv1d + folded BN + ReLU
    h2 = jnp.maximum(
        jnp.dot(h1.astype(jnp.bfloat16), w2_ref[...],
                preferred_element_type=jnp.float32) + sh2_ref[...], 0.0)
    # ConvBNReLURes1D.net2 (groups=1): Conv1d only; residual + ReLU
    h3 = jnp.dot(h2.astype(jnp.bfloat16), w3_ref[...],
                 preferred_element_type=jnp.float32) + b3_ref[...]
    h = jnp.maximum(h3 + h1, 0.0)
    # adaptive_max_pool1d(., 1): max over the K neighbour positions
    o_ref[0] = jnp.max(h.reshape(K, TG, Dp), axis=0)


# ------------------------------ Pallas wrappers -------------------------------

def pallas_fps(xyz_cf, S):
    """xyz_cf: (B, 3, N) -> (fps_idx (B, S) int32, new_xyz_cf (B, 3, S) f32)."""
    B, _, N = xyz_cf.shape
    idx, sel = pl.pallas_call(
        _fps_kernel,
        out_shape=(jax.ShapeDtypeStruct((B, 1, S), jnp.int32),
                   jax.ShapeDtypeStruct((B, 3, S), jnp.float32)),
        grid=(B,),
        in_specs=[pl.BlockSpec((1, 3, N), lambda b: (b, 0, 0))],
        out_specs=(pl.BlockSpec((1, 1, S), lambda b: (b, 0, 0)),
                   pl.BlockSpec((1, 3, S), lambda b: (b, 0, 0))),
        compiler_params=pltpu.CompilerParams(dimension_semantics=("parallel",)),
    )(xyz_cf)
    return idx[:, 0, :], sel


def pallas_square_distance(q_cf, p_cf):
    """q_cf: (B, 3, S), p_cf: (B, 3, N) -> (B, S, N) float32 squared distances."""
    B, _, S = q_cf.shape
    N = p_cf.shape[2]
    TN = _pick_tn(N)
    return pl.pallas_call(
        _sqdist_kernel,
        out_shape=jax.ShapeDtypeStruct((B, S, N), jnp.float32),
        grid=(B, N // TN),
        in_specs=[pl.BlockSpec((1, 3, S), lambda b, n: (b, 0, 0)),
                  pl.BlockSpec((1, 3, TN), lambda b, n: (b, 0, n))],
        out_specs=pl.BlockSpec((1, S, TN), lambda b, n: (b, 0, n)),
        compiler_params=pltpu.CompilerParams(
            dimension_semantics=("parallel", "parallel")),
    )(q_cf, p_cf)


def pallas_anchor_normalize(grouped, anchor, alpha_p, beta_p, c_real):
    """grouped: (B, K, S, C1p) f32, anchor: (B, S, C1p) f32 -> (B, K, S, C1p) bf16."""
    B, K, S, C1p = grouped.shape
    kernel = functools.partial(_anchor_norm_kernel, c_real=c_real)
    # TODO(synk): for very large S*K*C on v7x (64 MiB VMEM), split into a
    # moments pass + normalize pass tiled over S instead of one full-row block.
    return pl.pallas_call(
        kernel,
        out_shape=jax.ShapeDtypeStruct((B, K, S, C1p), jnp.bfloat16),
        grid=(B,),
        in_specs=[pl.BlockSpec((1, K, S, C1p), lambda b: (b, 0, 0, 0)),
                  pl.BlockSpec((1, S, C1p), lambda b: (b, 0, 0)),
                  pl.BlockSpec((1, C1p), lambda b: (0, 0)),
                  pl.BlockSpec((1, C1p), lambda b: (0, 0))],
        out_specs=pl.BlockSpec((1, K, S, C1p), lambda b: (b, 0, 0, 0)),
        compiler_params=pltpu.CompilerParams(
            dimension_semantics=("parallel",),
            vmem_limit_bytes=32 * 1024 * 1024),
    )(grouped, anchor, alpha_p, beta_p)


def pallas_extraction(y, anchor_feat, params, tg):
    """y: (B, K, S, C1p) bf16, anchor_feat: (B, S, Dinp) bf16 -> (B, S, Dp) f32."""
    B, K, S, C1p = y.shape
    Dinp = anchor_feat.shape[-1]
    Dp = params["w2_p"].shape[1]
    return pl.pallas_call(
        _extraction_kernel,
        out_shape=jax.ShapeDtypeStruct((B, S, Dp), jnp.float32),
        grid=(B, S // tg),
        in_specs=[pl.BlockSpec((1, K, tg, C1p), lambda b, s: (b, 0, s, 0)),
                  pl.BlockSpec((1, tg, Dinp), lambda b, s: (b, s, 0)),
                  pl.BlockSpec((C1p, Dp), lambda b, s: (0, 0)),
                  pl.BlockSpec((Dinp, Dp), lambda b, s: (0, 0)),
                  pl.BlockSpec((Dp, Dp), lambda b, s: (0, 0)),
                  pl.BlockSpec((Dp, Dp), lambda b, s: (0, 0)),
                  pl.BlockSpec((1, Dp), lambda b, s: (0, 0)),
                  pl.BlockSpec((1, Dp), lambda b, s: (0, 0)),
                  pl.BlockSpec((1, Dp), lambda b, s: (0, 0))],
        out_specs=pl.BlockSpec((1, tg, Dp), lambda b, s: (b, s, 0)),
        compiler_params=pltpu.CompilerParams(
            dimension_semantics=("parallel", "parallel"),
            vmem_limit_bytes=32 * 1024 * 1024),
    )(y, anchor_feat, params["w1a_p"], params["w1b_p"], params["w2_p"],
      params["w3_p"], params["sh1_p"], params["sh2_p"], params["b3_p"])


# --------------------------------- parameters ---------------------------------

def init_params(key, in_channels):
    """Random module weights, with eval-mode BatchNorm (fresh running stats:
    mean 0, var 1, gamma 1, beta 0) folded into the conv weights, the first conv
    split into grouped/anchor halves, and everything padded to 128-lane tiles."""
    D = in_channels
    C1 = D + 3                      # grouped feature channels (use_xyz=True)
    cin = 3 + 2 * D                 # PreExtraction transfer in_channels
    C1p = _round_up(C1, 128)
    Dp = _round_up(D, 128)
    Dinp = _round_up(D, 128)

    ks = jax.random.split(key, 6)
    bn_scale = (1.0 + 1e-5) ** -0.5
    w1 = 0.1 * jax.random.normal(ks[0], (cin, D), jnp.float32)
    b1 = 0.1 * jax.random.normal(ks[1], (D,), jnp.float32)
    w2 = 0.1 * jax.random.normal(ks[2], (D, D), jnp.float32)
    b2 = 0.1 * jax.random.normal(ks[3], (D,), jnp.float32)
    w3 = 0.1 * jax.random.normal(ks[4], (D, D), jnp.float32)
    b3 = 0.1 * jax.random.normal(ks[5], (D,), jnp.float32)

    # fold BN scale into the weights / biases (transfer and net1 only; net2 has no BN)
    w1_eff = w1 * bn_scale
    sh1 = b1 * bn_scale
    w2_eff = w2 * bn_scale
    sh2 = b2 * bn_scale
    w1a = w1_eff[:C1]               # rows multiplying the normalized grouped channels
    w1b = w1_eff[C1:]               # rows multiplying the anchor-feature channels

    def pad2(mat, rows, cols):
        return jnp.pad(mat, ((0, rows - mat.shape[0]), (0, cols - mat.shape[1])))

    def pad_row(vec, cols):
        return jnp.pad(vec.reshape(1, -1), ((0, 0), (0, cols - vec.shape[0])))

    return {
        "alpha_p": jnp.pad(jnp.ones((1, C1), jnp.float32), ((0, 0), (0, C1p - C1))),
        "beta_p": jnp.zeros((1, C1p), jnp.float32),
        "w1a_p": pad2(w1a, C1p, Dp).astype(jnp.bfloat16),
        "w1b_p": pad2(w1b, Dinp, Dp).astype(jnp.bfloat16),
        "w2_p": pad2(w2_eff, Dp, Dp).astype(jnp.bfloat16),
        "w3_p": pad2(w3, Dp, Dp).astype(jnp.bfloat16),
        "sh1_p": pad_row(sh1, Dp),
        "sh2_p": pad_row(sh2, Dp),
        "b3_p": pad_row(b3, Dp),
    }


# ---------------------------------- forward -----------------------------------

def local_grouper_forward(params, xyz_cf, feat_cf, groups, k):
    """xyz_cf: [B, 3, N], feat_cf: [B, D, N] -> (new_xyz [B,3,S], new_feat [B,D,S])."""
    xyz_cf = xyz_cf.astype(jnp.float32)
    feat_cf = feat_cf.astype(jnp.float32)
    B, _, N = xyz_cf.shape
    D = feat_cf.shape[1]
    S = groups
    K = k
    C1 = D + 3
    C1p = params["alpha_p"].shape[1]
    Dinp = params["w1b_p"].shape[0]

    # cluster(): FPS (indices + centroid coords from one kernel) + kNN via the
    # fused squared-distance matmul on the MXU
    fps_idx, new_xyz_cf = pallas_fps(xyz_cf, S)                       # (B,S) i32, (B,3,S)
    sqrdists = pallas_square_distance(new_xyz_cf, xyz_cf)             # (B, S, N)
    _, idx = lax.top_k(-sqrdists, K)                                  # (B, S, K) smallest
    # TODO(synk): fuse a running k-min selection into the distance kernel so the
    # full (B,S,N) matrix never round-trips HBM for very large N.

    # One pre-padded [feature | xyz | 0] source (B, N, C1p) so each gather lands
    # directly in the lane-padded layout the kernels consume -- no second pass
    # concatenating / zero-padding the big (B, K, S, *) tensor.
    feat_xyz = jnp.concatenate(
        [jnp.transpose(feat_cf, (0, 2, 1)),                           # (B, N, D)
         jnp.transpose(xyz_cf, (0, 2, 1)),                            # (B, N, 3)
         jnp.zeros((B, N, C1p - C1), jnp.float32)], axis=-1)          # (B, N, C1p)

    idx_t = jnp.swapaxes(idx, 1, 2)                                   # (B, K, S)
    grouped = jax.vmap(lambda p, i: p[i])(feat_xyz, idx_t)            # (B, K, S, C1p)
    anchor = jax.vmap(lambda p, i: p[i])(feat_xyz, fps_idx)           # (B, S, C1p)

    y = pallas_anchor_normalize(grouped, anchor, params["alpha_p"],
                                params["beta_p"], C1)                 # (B,K,S,C1p) bf16

    # raw (un-normalized) anchor features feed the second half of the first conv
    anchor_feat = jnp.concatenate(
        [anchor[:, :, :D], jnp.zeros((B, S, Dinp - D), jnp.float32)],
        axis=-1).astype(jnp.bfloat16)                                 # (B, S, Dinp)

    tg = _pick_tg(S, K)
    out = pallas_extraction(y, anchor_feat, params, tg)               # (B, S, Dp) f32
    new_feat_cf = jnp.transpose(out[:, :, :D], (0, 2, 1))             # (B, D, S)
    return new_xyz_cf, new_feat_cf


if __name__ == "__main__":
    B, D, N = 2, 8, 64     # batch, in_channels, points
    groups, k = 16, 8      # S centroids, k neighbors

    key = jax.random.PRNGKey(0)
    k_xyz, k_feat, k_par = jax.random.split(key, 3)
    xyz_cf = jax.random.normal(k_xyz, (B, 3, N), jnp.float32)    # [B, 3, N]
    feat_cf = jax.random.normal(k_feat, (B, D, N), jnp.float32)  # [B, D, N]
    params = init_params(k_par, D)

    new_xyz, new_feat = local_grouper_forward(params, xyz_cf, feat_cf, groups, k)
    jax.block_until_ready((new_xyz, new_feat))

    assert new_xyz.shape == (B, 3, groups)
    assert new_feat.shape == (B, D, groups)
    assert bool(jnp.all(jnp.isfinite(new_xyz))) and bool(jnp.all(jnp.isfinite(new_feat)))
    print("KERNEL_OK")
</pallas_src>

<mosaic_0001>
module attributes {stable_mosaic.version = 11 : i64} {
  func.func @_fps_kernel(%arg0: i32, %arg1: memref<1x3x64xf32, #tpu.memory_space<vmem>>, %arg2: memref<1x1x16xi32, #tpu.memory_space<vmem>>, %arg3: memref<1x3x16xf32, #tpu.memory_space<vmem>>) attributes {dimension_semantics = [#tpu.dimension_semantics<parallel>], iteration_bounds = array<i64: 2>, scalar_prefetch = 0 : i64, scratch_operands = 0 : i64, tpu.core_type = #tpu.core_type<tc>, window_params = [{transform_indices = @transform_0, window_bounds = array<i64: 1, 3, 64>}, {transform_indices = @transform_1, window_bounds = array<i64: 1, 1, 16>}, {transform_indices = @transform_2, window_bounds = array<i64: 1, 3, 16>}]} {
    %c0 = arith.constant 0 : index
    %c0_0 = arith.constant 0 : index
    %c0_1 = arith.constant 0 : index
    %0 = vector.load %arg1[%c0, %c0_0, %c0_1] : memref<1x3x64xf32, #tpu.memory_space<vmem>>, vector<1x3x64xf32>
    %1 = vector.shape_cast %0 : vector<1x3x64xf32> to vector<3x64xf32>
    %2 = tpu.iota {dimensions = array<i32: 1>} : vector<1x64xi32>
    %3 = tpu.iota {dimensions = array<i32: 1>} : vector<1x16xi32>
    %cst = arith.constant 1.000000e+10 : f32
    %4 = vector.broadcast %cst : f32 to vector<1x64xf32>
    %c0_i32 = arith.constant 0 : i32
    %5 = vector.broadcast %c0_i32 : i32 to vector<1x1xi32>
    %c0_i32_2 = arith.constant 0 : i32
    %6 = vector.broadcast %c0_i32_2 : i32 to vector<1x16xi32>
    %cst_3 = arith.constant 0.000000e+00 : f32
    %7 = vector.broadcast %cst_3 : f32 to vector<3x16xf32>
    %c1_i32 = arith.constant 1 : i32
    %c15_i32 = arith.constant 15 : i32
    %8 = arith.addi %c1_i32, %c15_i32 : i32
    %c1_i32_4 = arith.constant 1 : i32
    %9:4 = scf.for %arg4 = %c1_i32 to %8 step %c1_i32_4 iter_args(%arg5 = %4, %arg6 = %5, %arg7 = %6, %arg8 = %7) -> (vector<1x64xf32>, vector<1x1xi32>, vector<1x16xi32>, vector<3x16xf32>)  : i32 {
      %31 = vector.broadcast %arg6 : vector<1x1xi32> to vector<1x64xi32>
      %32 = arith.cmpi eq, %2, %31 : vector<1x64xi32>
      %cst_15 = arith.constant 0.000000e+00 : f32
      %33 = vector.shape_cast %32 : vector<1x64xi1> to vector<1x64xi1>
      %34 = vector.broadcast %33 : vector<1x64xi1> to vector<3x64xi1>
      %35 = vector.broadcast %cst_15 : f32 to vector<3x64xf32>
      %36 = arith.select %34, %1, %35 : vector<3x64xi1>, vector<3x64xf32>
      %cst_16 = arith.constant dense<0.000000e+00> : vector<3xf32>
      %37 = vector.multi_reduction <add>, %36, %cst_16 [1] : vector<3x64xf32> to vector<3xf32>
      %38 = vector.shape_cast %37 : vector<3xf32> to vector<3x1xf32>
      %c1_i32_17 = arith.constant 1 : i32
      %39 = arith.subi %arg4, %c1_i32_17 : i32
      %40 = vector.broadcast %39 : i32 to vector<1x16xi32>
      %41 = arith.cmpi eq, %3, %40 : vector<1x16xi32>
      %42 = vector.shape_cast %41 : vector<1x16xi1> to vector<1x16xi1>
      %43 = vector.broadcast %42 : vector<1x16xi1> to vector<3x16xi1>
      %44 = vector.shape_cast %38 : vector<3x1xf32> to vector<3x1xf32>
      %45 = vector.broadcast %44 : vector<3x1xf32> to vector<3x16xf32>
      %46 = arith.select %43, %45, %arg8 : vector<3x16xi1>, vector<3x16xf32>
      %47 = vector.broadcast %38 : vector<3x1xf32> to vector<3x64xf32>
      %48 = arith.subf %1, %47 : vector<3x64xf32>
      %49 = arith.mulf %48, %48 : vector<3x64xf32>
      %cst_18 = arith.constant dense<0.000000e+00> : vector<64xf32>
      %50 = vector.multi_reduction <add>, %49, %cst_18 [0] : vector<3x64xf32> to vector<64xf32>
      %51 = vector.shape_cast %50 : vector<64xf32> to vector<1x64xf32>
      %52 = arith.minimumf %arg5, %51 : vector<1x64xf32>
      %cst_19 = arith.constant dense<0xFF800000> : vector<1xf32>
      %53 = vector.multi_reduction <maximumf>, %52, %cst_19 [1] : vector<1x64xf32> to vector<1xf32>
      %54 = vector.shape_cast %53 : vector<1xf32> to vector<1x1xf32>
      %55 = vector.broadcast %54 : vector<1x1xf32> to vector<1x64xf32>
      %56 = arith.cmpf oeq, %52, %55 : vector<1x64xf32>
      %c64_i32 = arith.constant 64 : i32
      %57 = vector.broadcast %c64_i32 : i32 to vector<1x64xi32>
      %58 = arith.select %56, %2, %57 : vector<1x64xi1>, vector<1x64xi32>
      %cst_20 = arith.constant dense<2147483647> : vector<1xi32>
      %59 = vector.multi_reduction <minsi>, %58, %cst_20 [1] : vector<1x64xi32> to vector<1xi32>
      %60 = vector.shape_cast %59 : vector<1xi32> to vector<1x1xi32>
      %61 = vector.broadcast %arg4 : i32 to vector<1x16xi32>
      %62 = arith.cmpi eq, %3, %61 : vector<1x16xi32>
      %63 = vector.shape_cast %60 : vector<1x1xi32> to vector<1x1xi32>
      %64 = vector.broadcast %63 : vector<1x1xi32> to vector<1x16xi32>
      %65 = arith.select %62, %64, %arg7 : vector<1x16xi1>, vector<1x16xi32>
      scf.yield %52, %60, %65, %46 : vector<1x64xf32>, vector<1x1xi32>, vector<1x16xi32>, vector<3x16xf32>
    }
    %c15_i32_5 = arith.constant 15 : i32
    %c15_i32_6 = arith.constant 15 : i32
    %10 = vector.broadcast %c15_i32_6 : i32 to vector<1x16xi32>
    %11 = arith.cmpi eq, %3, %10 : vector<1x16xi32>
    %12 = vector.broadcast %9#1 : vector<1x1xi32> to vector<1x64xi32>
    %13 = arith.cmpi eq, %2, %12 : vector<1x64xi32>
    %cst_7 = arith.constant 0.000000e+00 : f32
    %14 = vector.shape_cast %13 : vector<1x64xi1> to vector<1x64xi1>
    %15 = vector.broadcast %14 : vector<1x64xi1> to vector<3x64xi1>
    %16 = vector.broadcast %cst_7 : f32 to vector<3x64xf32>
    %17 = arith.select %15, %1, %16 : vector<3x64xi1>, vector<3x64xf32>
    %cst_8 = arith.constant dense<0.000000e+00> : vector<3xf32>
    %18 = vector.multi_reduction <add>, %17, %cst_8 [1] : vector<3x64xf32> to vector<3xf32>
    %19 = vector.shape_cast %18 : vector<3xf32> to vector<3x1xf32>
    %20 = vector.shape_cast %11 : vector<1x16xi1> to vector<1x16xi1>
    %21 = vector.broadcast %20 : vector<1x16xi1> to vector<3x16xi1>
    %22 = vector.shape_cast %19 : vector<3x1xf32> to vector<3x1xf32>
    %23 = vector.broadcast %22 : vector<3x1xf32> to vector<3x16xf32>
    %24 = arith.select %21, %23, %9#3 : vector<3x16xi1>, vector<3x16xf32>
    %c0_9 = arith.constant 0 : index
    %c0_10 = arith.constant 0 : index
    %c0_11 = arith.constant 0 : index
    %25 = vector.load %arg2[%c0_9, %c0_10, %c0_11] : memref<1x1x16xi32, #tpu.memory_space<vmem>>, vector<1x1x16xi32>
    %26 = vector.shape_cast %25 : vector<1x1x16xi32> to vector<1x16xi32>
    %27 = vector.shape_cast %9#2 : vector<1x16xi32> to vector<1x1x16xi32>
    tpu.vector_store %arg2[%c0_9, %c0_10, %c0_11], %27 {strides = array<i32>} : memref<1x1x16xi32, #tpu.memory_space<vmem>>, vector<1x1x16xi32>,
    %c0_12 = arith.constant 0 : index
    %c0_13 = arith.constant 0 : index
    %c0_14 = arith.constant 0 : index
    %28 = vector.load %arg3[%c0_12, %c0_13, %c0_14] : memref<1x3x16xf32, #tpu.memory_space<vmem>>, vector<1x3x16xf32>
    %29 = vector.shape_cast %28 : vector<1x3x16xf32> to vector<3x16xf32>
    %30 = vector.shape_cast %24 : vector<3x16xf32> to vector<1x3x16xf32>
    tpu.vector_store %arg3[%c0_12, %c0_13, %c0_14], %30 {strides = array<i32>} : memref<1x3x16xf32, #tpu.memory_space<vmem>>, vector<1x3x16xf32>,
    return
  }
  func.func @transform_0(%arg0: i32) -> (i32, i32, i32) {
    %c0_i32 = arith.constant 0 : i32
    %c0_i32_0 = arith.constant 0 : i32
    %c0_i32_1 = arith.constant 0 : i32
    return %arg0, %c0_i32, %c0_i32_0 : i32, i32, i32
  }
  func.func @transform_1(%arg0: i32) -> (i32, i32, i32) {
    %c0_i32 = arith.constant 0 : i32
    %c0_i32_0 = arith.constant 0 : i32
    %c0_i32_1 = arith.constant 0 : i32
    return %arg0, %c0_i32, %c0_i32_0 : i32, i32, i32
  }
  func.func @transform_2(%arg0: i32) -> (i32, i32, i32) {
    %c0_i32 = arith.constant 0 : i32
    %c0_i32_0 = arith.constant 0 : i32
    %c0_i32_1 = arith.constant 0 : i32
    return %arg0, %c0_i32, %c0_i32_0 : i32, i32, i32
  }
}

</mosaic_0001>

<bundles_post_ra>
// kernel: tpu_custom_call.1
= control target key start
LH: loop header
LB: loop body
LE: loop exit
PB: predicated region body
PF: predicated region fallthrough
CT: control target
= control target key end

     0   :  { %8 = vsyncpa [#allocation3], 0  ;;  %s683_s0 = inlined_call_operand.vmem [shape: f32[2,3,64], index: 0, kind: input, shape index: {}]   ;;  %s684_s1 = inlined_call_operand.hbm [shape: s32[2,1,16], index: 1, kind: output, shape index: {0}]   ;;  %s685_s2 = inlined_call_operand.vmem [shape: f32[2,3,16], index: 2, kind: output, shape index: {1}]  }
   0x1   :  { %10 = vsyncpa [#allocation3 + $0x1], 0  ;;  %s549_s9 = smov 0   ;;  %s551_s10 = smov 0  }
   0x2   :  { %s553_s11 = smov 0   ;;  %s555_s12 = smov 0  }
   0x3 LB: > { %s570_s13 = sadd.s32 4294967295, %s512_s12   ;;  %s342_s14 = sadd.s32 4294967294, %s512_s12   ;;  %s512_s12 = sphi %s555_s12, %s693_s12   ;;  %s508_s11 = sphi %s553_s11, %s692_s11   ;;  %s504_s10 = sphi %s551_s10, %s691_s10   ;;  %s500_s9 = sphi %s549_s9, %s690_s9  }
   0x4   : > { %s574_s15 = sadd.s32 1, %s512_s12   ;;  %s49_s16 = sadd.s32 1, %s508_s11 }
   0x5   : > { %s46_s17 = ssub.s32 %s512_s12, %s574_s15  ;;  %p59_p0 = scmp.ne.s32.totalorder %s508_s11, %s504_s10 }
   0x6   : > { %p47_p1 = scmp.eq.s32.totalorder %s46_s17, 0  ;;  %p60_p2 = scmp.eq.s32.totalorder %s570_s13, 1 }
   0x7   : > { %p65_p3 = scmp.ne.s32.totalorder %s504_s10, %s500_s9  ;;  %p66_p4 = scmp.eq.s32.totalorder %s342_s14, 1 }
   0x8   : > { %s585_s18 = scalar_select %p47_p1, %s508_s11, %s49_s16  }
   0x9   : > { %p587_p5 = por %p60_p2, %p59_p0  ;;  %p591_p6 = por %p66_p4, %p65_p3 }
   0xa   : > { %p345_p7 = scmp.ge.s32.totalorder %s512_s12, 1  ;;  %p117_p8 = scmp.lt.s32.totalorder %s512_s12, 3 }
   0xc   : > { %p118_p9 = pnand %p345_p7, %p117_p8 }
   0xd   : > { %s133_s21 = sand.u32 (!%p118_p9), 1, %s504_s10   ;;  %p141_p10 = scmp.lt.s32.totalorder (!%p118_p9), %s570_s13, 1 }
   0xe   : > { %121 = sbr.rel (%p118_p9) target bundleno = 645 (0x285), region = 24  ;;  %s614_s30 = scalar_lea.vmem (!%p118_p9), [#allocation2], %s133_s21 }
   0xf   : > { %s618_s3 = smov (!%p118_p9), 1  }
  0x13   : > { %v150_v0 = vlaneseq  ;;  %s142_s22 = scalar_select %p141_p10, %s570_s13, 1  ;;  %v616_v3 = vmov 0.0   ;;  %v518_v4 = vmov 0   ;;  %v522_v5 = vmov 0  }
  0x14   : > { %v526_v6 = vmov 1e+10  }
  0x15   : > { %v600_v1 = vand.u32 127, %v150_v0  ;;  %s346_s23 = sshll.u32 %s142_s22, 2 }
  0x16   : > { %s144_s26 = scalar_lea.vmem %s683_s0, %s346_s23  ;;  %s608_s29 = scalar_lea.vmem %s685_s2, %s346_s23 }
  0x17   : > { %v610_v2 = vld [vmem:[%s144_s26] sm:$0x7] }
  0x18 LB: >> { %vm166_vm0 = vcmask 518144   ;;  %vm162_vm1 = vcmp.eq.s32.totalorder %v600_v1, %v524_v5  ;;  %s348_s4 = sadd.s32 4294967295, %s532_s3  ;;  %vm186_vm3 = vcmask 523264   ;;  %v207_v32 = vstv %s532_s3  ;;  %s157_s3 = sadd.s32 1, %s532_s3   ;;  %s532_s3 = sphi %s618_s3, %s157_s3   ;;  %v528_v6 = vphi %v526_v6, %v185_v6   ;;  %v524_v5 = vphi %v522_v5, %v523_v5   ;;  %v520_v4 = vphi %v518_v4, %v519_v4   ;;  %v516_v3 = vphi %v616_v3, %v689_v3  }
  0x19   : >> { %v165_v7 = vsel %vm162_vm1, %v610_v2, 0.0  ;;  %v171_v9 = vstv %s348_s4  ;;  %vm208_vm6 = vcmp.eq.s32.totalorder %v600_v1, %v207_v32  ;;  %p154_p11 = scmp.ge.s32.totalorder %s157_s3, 16  }
  0x1a   : >> { %v167_v8 = vsel %vm166_vm0, %v165_v7, 0.0  ;;  %vm172_vm2 = vcmp.eq.s32.totalorder %v600_v1, %v171_v9  ;;  %s239_s7 = scalar_lea.hbm (%p154_p11), %s684_s1, %s570_s13  ;;  %s241_s8 = sshll.u32 (%p154_p11), %s614_s30, 4  ;;  %vm222_vm8 = vcmask (%p154_p11), 122880   ;;  %s242_s8 = int_to_ptr.vmem [resolvable:$true] %s241_s8 }
  0x1b   : >> { %168 = vadd.xlane.f32.xlu0 %v167_v8  ;;  %s243_s14 = sshll.u32 (%p154_p11), %s239_s7, 4  ;;  %s227_s16 = scalar_lea.sflag (%p154_p11), [#allocation3], %s133_s21  ;;  %s244_s14 = int_to_ptr.hbm [resolvable:$true] %s243_s14 }
  0x1c   : > { %s444_s17 = sshra.s32 (%p154_p11), %s244_s14, 4  ;;  %s450_s25 = scalar_lea.hbm (%p154_p11), %s684_s1, 2  ;;  %s445_s17 = int_to_ptr.hbm [resolvable:$true] %s444_s17 }
  0x1d   : > { %s446_s22 = scalar_lea.hbm (%p154_p11), %s445_s17, 1  ;;  %p451_p1 = scmp.lt.s32.totalorder (%p154_p11), %s445_s17, %s684_s1 }
  0x1e   : > { %p447_p12 = scmp.ne.s32.totalorder (%p154_p11), %s445_s17, %s446_s22  ;;  %p452_p2 = scmp.lt.s32.totalorder (%p154_p11), %s450_s25, %s446_s22 }
  0x20   : > { %p448_p13 = pnand (%p154_p11), %p447_p12, %p587_p5  ;;  %p453_p3 = por (%p154_p11), %p452_p2, %p451_p1 }
  0x22   : > { %p449_p0 = pneg (%p154_p11), %p448_p13 }
  0x24   : > { %p454_p4 = pnand (%p154_p11), %p453_p3, %p449_p0 }
  0x8e   : >> { %v169_v10 = vpop.xlane.xlu0 %168 }
  0x8f   : >> { %v629_v3 = vsel %vm172_vm2, %v169_v10, %v516_v3   ;;  %v176_v12 = vsub.f32 %v610_v2, %v169_v10 }
  0x90   : >> { %v688_v11 = vmov %v629_v3 }
  0x91   : >> { %v177_v13 = vmul.f32 %v176_v12, %v176_v12  ;;  %v689_v3 = vmov %v688_v11 }
  0x93   : >> { %v178_v14 = vsel %vm166_vm0, %v177_v13, 0.0 }
  0x94   : >> { %v179_v15 = vrot.slane %v178_v14, 4 }
  0x96   : >> { %v180_v16 = vadd.f32 %v179_v15, %v178_v14 }
  0x98   : >> { %v181_v17 = vrot.slane %v180_v16, 2 }
  0x9a   : >> { %v182_v18 = vadd.f32 %v181_v17, %v180_v16 }
  0x9c   : >> { %v183_v19 = vrot.slane %v182_v18, 1 }
  0x9e   : >> { %v184_v20 = vadd.f32 %v183_v19, %v182_v18 }
  0xa0   : >> { %v185_v6 = vmin.f32 %v528_v6, %v184_v20  }
  0xa2   : >> { %v187_v21 = vsel %vm186_vm3, %v185_v6, -inf }
  0xa3   : >> { %188 = vmax.xlane.f32.xlu0 %v187_v21 }
 0x116   : >> { %v189_v22 = vpop.xlane.xlu0 %188 }
 0x117   : >> { %vm190_vm4 = vcmp.eq.f32.partialorder %v185_v6, %v189_v22 }
 0x118   : >> { %v191_v23 = vsel %vm190_vm4, %v600_v1, 64 }
 0x119   : >> { %v192_v24 = vsel %vm186_vm3, %v191_v23, 2147483647 }
 0x11a   : >> { %v194_v25 = vshra.s32 %v192_v24, 16  ;;  %v193_v27 = vand.u32 65535, %v192_v24 }
 0x11c   : >> { %v196_v26 = vcvt.s32.f32 %v194_v25  ;;  %v195_v29 = vcvt.s32.f32 %v193_v27 }
 0x11e   : >> { %197 = vmin.xlane.f32.xlu1 %v196_v26 }
 0x191   : >> { %v198_v28 = vpop.xlane.xlu1 %197 }
 0x192   : >> { %vm199_vm5 = vcmp.eq.f32.partialorder %v196_v26, %v198_v28  ;;  %v204_v31 = vcvt.f32.s32 %v198_v28 }
 0x193   : >> { %v200_v30 = vsel %vm199_vm5, %v195_v29, inf }
 0x194   : >> { %201 = vmin.xlane.f32.xlu1 %v200_v30  ;;  %v205_v34 = vshll.u32 %v204_v31, 16 }
 0x207   : >> { %v202_v33 = vpop.xlane.xlu1 %201 }
 0x208   : >> { %v203_v35 = vcvt.f32.s32 %v202_v33 }
 0x209   : > { %156 = sbr.rel (!%p154_p11) target bundleno = 24 (0x18), region = 78 }
 0x20a   : >> { %v206_v36 = vadd.s32 %v205_v34, %v203_v35  }
 0x20c   : >> { %v209_v37 = vsel %vm208_vm6, %v206_v36, %v520_v4   ;;  %v523_v5 = vmov %v206_v36   ;;  %vm211_vm7 = vcmp.eq.s32.totalorder (%p154_p11), %v600_v1, %v206_v36 }
 0x20d   : >> { %v519_v4 = vmov %v209_v37   ;;  %v214_v38 = vsel (%p154_p11), %vm211_vm7, %v610_v2, 0.0  ;;  %223 = vst.msk [vmem:[%s614_s30] sm:$0x1] (%p154_p11), %vm222_vm8, %v209_v37 }
 0x20e   : > { %v216_v39 = vsel %vm166_vm0, %v214_v38, 0.0 }
 0x20f   : > { %217 = vadd.xlane.f32.xlu0 %v216_v39 }
 0x210   : > { %457 = shalt.err (!%p454_p4)
}
 0x211   : > { %351 = dma.vmem_to_hbm [thread:$0]  (%p587_p5), %s242_s8, 16, %s244_s14, %s227_s16   ;;  %vm210_vm9 = vcmp.eq.s32.totalorder %v600_v1, 15  ;;  %vm224_vm10 = vcmask 124928  }
 0x282   : > { %v218_v40 = vpop.xlane.xlu0 %217 }
 0x283   : > { %v221_v41 = vsel %vm210_vm9, %v218_v40, %v688_v11 }
 0x284   : > { %225 = vst.msk [vmem:[%s608_s29] sm:$0x7] %vm224_vm10, %v221_v41 }
 0x285 PF: > { %p357_p7 = scmp.ge.s32.totalorder %s512_s12, 2  ;;  %s258_s21 = sand.u32 1, %s500_s9  }
 0x286   : > { %s259_s27 = scalar_lea.sflag [#allocation3], %s258_s21 }
 0x287   : > { %p354_p8 = pnand %p357_p7, %p591_p6 }
 0x289   : > { %p355_p9 = pneg %p354_p8 }
 0x28b   : > { %495 = dma.done.wait (%p355_p9), %s259_s27, 16  }
 0x28c   : > { %497 = vsyncadd (%p355_p9), %s259_s27, 4294967280  ;;  %p13_p5 = scmp.ge.s32.totalorder %s574_s15, 4   ;;  %s690_s9 = smov %s504_s10 }
 0x28d   : > { %s691_s10 = smov %s508_s11  ;;  %s692_s11 = smov %s585_s18 }
 0x28e   : > { %s693_s12 = smov %s574_s15  ;;  %15 = sbr.rel (!%p13_p5) target bundleno = 3 (0x3), region = 89 }
 0x293   :  { %271 = vsyncpa [#allocation3], 1 }
 0x294   :  { %273 = vsyncpa [#allocation3 + $0x1], 1 }

</bundles_post_ra>
